<compile_context>
chip_gen: v7x
topology: tpu7x:2x2x1
jax: 0.10.0
libtpu: 0.0.40
codegen_flags: <defaults>
</compile_context>

<pallas_src>
import functools
import math

import numpy as np
import jax
import jax.numpy as jnp
from jax.experimental import pallas as pl
from jax.experimental.pallas import tpu as pltpu


def _make_kernel(fs, B, NF):
    """Kernel closure.  fs, B, NF are static Python scalars."""
    half_sqrt_2pi = 0.5 * math.sqrt(2.0 * math.pi)
    two_pi_over_fs = 2.0 * math.pi / fs

    def kernel(q_ref, fc_ref, n_ref, alt_ref, dft_ref, out_ref):
        # q_ref, fc_ref : (R, 1)   per-row Q[b,i] and fc[i]      (R = B*NF)
        # n_ref         : (1, T)   time samples, REVERSED: T, T-1, ..., 1
        # alt_ref       : (1, T)   (-1)^t over array position (Nyquist bin)
        # dft_ref       : (T, 512) bf16 fused rfft basis: cos k=0..255 | sin k=0..255
        # out_ref       : (R, T)
        q = q_ref[...]                      # (R, 1)
        fc = fc_ref[...]                    # (R, 1)
        n = n_ref[...]                      # (1, T)

        # gabor(): BW = band/Q ; alpha = BW/2*sqrt(2*pi) ; b = alpha/fs ;
        #          Omega_c = 2*pi*band/fs
        b = (fc / q) * (half_sqrt_2pi / fs)         # (R, 1)
        omega = fc * two_pi_over_fs                 # (R, 1)

        # y is the ALREADY time-flipped filter (n is reversed on the host).
        y = jnp.exp(-(b * b) * (n * n)) * jnp.cos(omega * n)   # (R, T) f32

        # |rfft(y, n=512)|^2 for bins 0..255 via a single bf16 MXU matmul.
        z = jnp.dot(y.astype(jnp.bfloat16), dft_ref[...],
                    preferred_element_type=jnp.float32)        # (R, 512)
        re = z[:, :256]
        im = z[:, 256:]
        mag2 = re * re + im * im                                # (R, 256)

        # Nyquist bin k=256: X[256] = sum_t y[t]*(-1)^t  (VPU mul + lane reduce).
        nyq = jnp.sum(y * alt_ref[...], axis=1, keepdims=True)  # (R, 1)

        rowmax = jnp.maximum(jnp.max(mag2, axis=1, keepdims=True), nyq * nyq)

        # maxfft per filter = max over batch rows and frequency bins
        # (PyTorch: np.max(fft_bp) over the whole batch of that filter).
        gmax = rowmax[0:NF, :]                                   # (NF, 1)
        for bb in range(1, B):
            gmax = jnp.maximum(gmax, rowmax[bb * NF:(bb + 1) * NF, :])
        inv = jax.lax.rsqrt(gmax)                                # (NF, 1), EUP

        # Broadcast the per-filter scale back to all rows; one full-tile store.
        inv_row = jnp.concatenate([inv] * B, axis=0) if B > 1 else inv  # (R, 1)
        out_ref[...] = y * inv_row

    return kernel


@functools.lru_cache(maxsize=8)
def _constants(filt_dim, fs):
    """Device-resident constant inputs, cached across calls."""
    T = int(filt_dim - 1)
    # t_right * fs == 1..T exactly; reversed so the kernel's y is the flipped filter.
    n_rev = np.arange(T, 0, -1, dtype=np.float64).reshape(1, T)
    # (-1)^t over the array position t (for the k=256 Nyquist rfft bin).
    alt = np.where(np.arange(T) % 2 == 0, 1.0, -1.0).reshape(1, T)
    # Fused real-DFT basis for an n=512 rfft, bins k = 0..255.
    t = np.arange(T, dtype=np.float64)[:, None]
    k = np.arange(256, dtype=np.float64)[None, :]
    ang = 2.0 * np.pi * t * k / 512.0
    dft = np.concatenate([np.cos(ang), np.sin(ang)], axis=1)     # (T, 512)
    return (jnp.asarray(n_rev, jnp.float32),
            jnp.asarray(alt, jnp.float32),
            jnp.asarray(dft, jnp.bfloat16))


@functools.lru_cache(maxsize=8)
def _build_call(B, NF, T, fs):
    """Cached pallas_call closure (avoids per-call re-trace / re-compile)."""
    R = B * NF
    kernel = _make_kernel(fs, B, NF)
    return pl.pallas_call(
        kernel,
        out_shape=jax.ShapeDtypeStruct((R, T), jnp.float32),
        grid=(1,),
        in_specs=[
            pl.BlockSpec((R, 1), lambda i: (0, 0)),
            pl.BlockSpec((R, 1), lambda i: (0, 0)),
            pl.BlockSpec((1, T), lambda i: (0, 0)),
            pl.BlockSpec((1, T), lambda i: (0, 0)),
            pl.BlockSpec((T, 512), lambda i: (0, 0)),
        ],
        out_specs=pl.BlockSpec((R, T), lambda i: (0, 0)),
        compiler_params=pltpu.CompilerParams(
            dimension_semantics=("arbitrary",)),
    )


def gabor_fixed_response(Q, fc, *, filt_dim, fs):
    """Pallas equivalent of gabor_fixedResponse.forward(QTemp).

    Q  : (Batch_Size, N_filt) float array (the forward input QTemp)
    fc : (N_filt,) filter center frequencies (the module's `fc` ctor arg)
    Returns filters of shape (Batch_Size, N_filt, filt_dim - 1), float32.
    """
    B, NF = Q.shape
    T = int(filt_dim - 1)
    R = B * NF

    n_rev, alt, dft = _constants(int(filt_dim), float(fs))

    fc = np.asarray(fc, np.float32).reshape(NF)
    fc_col = jnp.asarray(np.tile(fc, B).reshape(R, 1))       # row r=b*NF+i -> fc[i]
    q_col = jnp.asarray(Q, jnp.float32).reshape(R, 1)        # row r=b*NF+i -> Q[b,i]

    out2d = _build_call(B, NF, T, float(fs))(q_col, fc_col, n_rev, alt, dft)
    return out2d.reshape(B, NF, T)


def _reference(Q, fc, filt_dim, fs):
    """Pure numpy (float64) reference of the PyTorch forward."""
    B, NF = Q.shape
    T = int(filt_dim - 1)
    t_right = np.linspace(1.0, filt_dim - 1, T) / fs
    nT = t_right * fs
    out = np.zeros((B, NF, T))
    for i in range(NF):
        band = float(fc[i])
        b = (band / Q[:, i]) / 2.0 * np.sqrt(2.0 * np.pi) / fs     # (B,)
        omega = 2.0 * np.pi * band / fs
        y = np.exp(-(b[:, None] ** 2) * nT[None, :] ** 2) * np.cos(omega * nT[None, :])
        maxfft = np.abs(np.fft.rfft(y, n=512)).max()
        out[:, i, :] = (y / maxfft)[:, ::-1]
    return out


if __name__ == "__main__":
    # Small, module-consistent shapes.
    N_filt, Filt_dim, Batch_Size = 8, 65, 2
    fs = 16000.0

    # Deterministic fc (filter center frequencies), mirroring __init__'s f_cos.
    fdelta = fs / 2.0 / N_filt
    fc = np.arange(fdelta / 2.0, fs / 2.0, fdelta)[:N_filt]

    key = jax.random.PRNGKey(0)
    Q = jax.random.uniform(key, (Batch_Size, N_filt), jnp.float32, 2.0, 10.0)

    filters = gabor_fixed_response(Q, fc, filt_dim=Filt_dim, fs=fs)
    filters = jax.block_until_ready(filters)

    assert filters.shape == (Batch_Size, N_filt, Filt_dim - 1)
    assert np.all(np.isfinite(np.asarray(filters)))

    ref = _reference(np.asarray(Q, np.float64), fc, Filt_dim, fs)
    np.testing.assert_allclose(np.asarray(filters), ref, rtol=5e-2, atol=5e-3)

    print("KERNEL_OK")
</pallas_src>

<mosaic_0001>
module attributes {stable_mosaic.version = 11 : i64} {
  func.func @kernel(%arg0: i32, %arg1: memref<16x1xf32, #tpu.memory_space<vmem>>, %arg2: memref<16x1xf32, #tpu.memory_space<vmem>>, %arg3: memref<1x64xf32, #tpu.memory_space<vmem>>, %arg4: memref<1x64xf32, #tpu.memory_space<vmem>>, %arg5: memref<64x512xbf16, #tpu.memory_space<vmem>>, %arg6: memref<16x64xf32, #tpu.memory_space<vmem>>) attributes {dimension_semantics = [#tpu.dimension_semantics<arbitrary>], iteration_bounds = array<i64: 1>, scalar_prefetch = 0 : i64, scratch_operands = 0 : i64, tpu.core_type = #tpu.core_type<tc>, window_params = [{pipeline_mode = #tpu.pipeline_mode<synchronous>, transform_indices = @transform_0, window_bounds = array<i64: 16, 1>}, {pipeline_mode = #tpu.pipeline_mode<synchronous>, transform_indices = @transform_1, window_bounds = array<i64: 16, 1>}, {pipeline_mode = #tpu.pipeline_mode<synchronous>, transform_indices = @transform_2, window_bounds = array<i64: 1, 64>}, {pipeline_mode = #tpu.pipeline_mode<synchronous>, transform_indices = @transform_3, window_bounds = array<i64: 1, 64>}, {pipeline_mode = #tpu.pipeline_mode<synchronous>, transform_indices = @transform_4, window_bounds = array<i64: 64, 512>}, {pipeline_mode = #tpu.pipeline_mode<synchronous>, transform_indices = @transform_5, window_bounds = array<i64: 16, 64>}]} {
    %c0 = arith.constant 0 : index
    %c0_0 = arith.constant 0 : index
    %0 = vector.load %arg1[%c0, %c0_0] : memref<16x1xf32, #tpu.memory_space<vmem>>, vector<16x1xf32>
    %c0_1 = arith.constant 0 : index
    %c0_2 = arith.constant 0 : index
    %1 = vector.load %arg2[%c0_1, %c0_2] : memref<16x1xf32, #tpu.memory_space<vmem>>, vector<16x1xf32>
    %c0_3 = arith.constant 0 : index
    %c0_4 = arith.constant 0 : index
    %2 = vector.load %arg3[%c0_3, %c0_4] : memref<1x64xf32, #tpu.memory_space<vmem>>, vector<1x64xf32>
    %3 = arith.divf %1, %0 : vector<16x1xf32>
    %cst = arith.constant 7.83321302E-5 : f32
    %4 = vector.broadcast %cst : f32 to vector<16x1xf32>
    %5 = arith.mulf %3, %4 : vector<16x1xf32>
    %cst_5 = arith.constant 3.9269909E-4 : f32
    %6 = vector.broadcast %cst_5 : f32 to vector<16x1xf32>
    %7 = arith.mulf %1, %6 : vector<16x1xf32>
    %8 = arith.mulf %5, %5 : vector<16x1xf32>
    %cst_6 = arith.constant 0.000000e+00 : f32
    %9 = vector.broadcast %cst_6 : f32 to vector<16x1xf32>
    %10 = arith.subf %9, %8 : vector<16x1xf32>
    %11 = arith.mulf %2, %2 : vector<1x64xf32>
    %12 = vector.broadcast %10 : vector<16x1xf32> to vector<16x64xf32>
    %13 = vector.broadcast %11 : vector<1x64xf32> to vector<16x64xf32>
    %14 = arith.mulf %12, %13 : vector<16x64xf32>
    %15 = math.exp %14 : vector<16x64xf32>
    %16 = vector.broadcast %7 : vector<16x1xf32> to vector<16x64xf32>
    %17 = vector.broadcast %2 : vector<1x64xf32> to vector<16x64xf32>
    %18 = arith.mulf %16, %17 : vector<16x64xf32>
    %19 = math.cos %18 : vector<16x64xf32>
    %20 = arith.mulf %15, %19 : vector<16x64xf32>
    %21 = arith.truncf %20 : vector<16x64xf32> to vector<16x64xbf16>
    %c0_7 = arith.constant 0 : index
    %c0_8 = arith.constant 0 : index
    %22 = vector.load %arg5[%c0_7, %c0_8] : memref<64x512xbf16, #tpu.memory_space<vmem>>, vector<64x512xbf16>
    %cst_9 = arith.constant dense<0.000000e+00> : vector<16x512xf32>
    %23 = tpu.matmul %21, %22, %cst_9 {dimension_numbers = #tpu.dot_dimension_numbers<[1], [0], [0], [1], [0, 0, 1, 1], [], []>} : vector<16x64xbf16>, vector<64x512xbf16>, vector<16x512xf32> -> vector<16x512xf32>
    %24 = vector.extract_strided_slice %23 {offsets = [0, 0], sizes = [16, 256], strides = [1, 1]} : vector<16x512xf32> to vector<16x256xf32>
    %25 = vector.extract_strided_slice %23 {offsets = [0, 256], sizes = [16, 256], strides = [1, 1]} : vector<16x512xf32> to vector<16x256xf32>
    %26 = arith.mulf %24, %24 : vector<16x256xf32>
    %27 = arith.mulf %25, %25 : vector<16x256xf32>
    %28 = arith.addf %26, %27 : vector<16x256xf32>
    %c0_10 = arith.constant 0 : index
    %c0_11 = arith.constant 0 : index
    %29 = vector.load %arg4[%c0_10, %c0_11] : memref<1x64xf32, #tpu.memory_space<vmem>>, vector<1x64xf32>
    %30 = vector.broadcast %29 : vector<1x64xf32> to vector<16x64xf32>
    %31 = arith.mulf %20, %30 : vector<16x64xf32>
    %cst_12 = arith.constant dense<0.000000e+00> : vector<16xf32>
    %32 = vector.multi_reduction <add>, %31, %cst_12 [1] : vector<16x64xf32> to vector<16xf32>
    %33 = vector.shape_cast %32 : vector<16xf32> to vector<16x1xf32>
    %cst_13 = arith.constant dense<0xFF800000> : vector<16xf32>
    %34 = vector.multi_reduction <maximumf>, %28, %cst_13 [1] : vector<16x256xf32> to vector<16xf32>
    %35 = vector.shape_cast %34 : vector<16xf32> to vector<16x1xf32>
    %36 = arith.mulf %33, %33 : vector<16x1xf32>
    %37 = arith.maximumf %35, %36 : vector<16x1xf32>
    %38 = vector.extract_strided_slice %37 {offsets = [0, 0], sizes = [8, 1], strides = [1, 1]} : vector<16x1xf32> to vector<8x1xf32>
    %39 = vector.extract_strided_slice %37 {offsets = [8, 0], sizes = [8, 1], strides = [1, 1]} : vector<16x1xf32> to vector<8x1xf32>
    %40 = arith.maximumf %38, %39 : vector<8x1xf32>
    %41 = math.rsqrt %40 : vector<8x1xf32>
    %42 = tpu.concatenate %41, %41 in 0 : vector<8x1xf32>, vector<8x1xf32> -> vector<16x1xf32>
    %43 = vector.broadcast %42 : vector<16x1xf32> to vector<16x64xf32>
    %44 = arith.mulf %20, %43 : vector<16x64xf32>
    %c0_14 = arith.constant 0 : index
    %c0_15 = arith.constant 0 : index
    %45 = vector.load %arg6[%c0_14, %c0_15] : memref<16x64xf32, #tpu.memory_space<vmem>>, vector<16x64xf32>
    tpu.vector_store %arg6[%c0_14, %c0_15], %44 {strides = array<i32>} : memref<16x64xf32, #tpu.memory_space<vmem>>, vector<16x64xf32>,
    return
  }
  func.func @transform_0(%arg0: i32) -> (i32, i32) {
    %c0_i32 = arith.constant 0 : i32
    %c0_i32_0 = arith.constant 0 : i32
    %c0_i32_1 = arith.constant 0 : i32
    return %c0_i32, %c0_i32_0 : i32, i32
  }
  func.func @transform_1(%arg0: i32) -> (i32, i32) {
    %c0_i32 = arith.constant 0 : i32
    %c0_i32_0 = arith.constant 0 : i32
    %c0_i32_1 = arith.constant 0 : i32
    return %c0_i32, %c0_i32_0 : i32, i32
  }
  func.func @transform_2(%arg0: i32) -> (i32, i32) {
    %c0_i32 = arith.constant 0 : i32
    %c0_i32_0 = arith.constant 0 : i32
    %c0_i32_1 = arith.constant 0 : i32
    return %c0_i32, %c0_i32_0 : i32, i32
  }
  func.func @transform_3(%arg0: i32) -> (i32, i32) {
    %c0_i32 = arith.constant 0 : i32
    %c0_i32_0 = arith.constant 0 : i32
    %c0_i32_1 = arith.constant 0 : i32
    return %c0_i32, %c0_i32_0 : i32, i32
  }
  func.func @transform_4(%arg0: i32) -> (i32, i32) {
    %c0_i32 = arith.constant 0 : i32
    %c0_i32_0 = arith.constant 0 : i32
    %c0_i32_1 = arith.constant 0 : i32
    return %c0_i32, %c0_i32_0 : i32, i32
  }
  func.func @transform_5(%arg0: i32) -> (i32, i32) {
    %c0_i32 = arith.constant 0 : i32
    %c0_i32_0 = arith.constant 0 : i32
    %c0_i32_1 = arith.constant 0 : i32
    return %c0_i32, %c0_i32_0 : i32, i32
  }
}

</mosaic_0001>

<bundles_post_ra>
// kernel: tpu_custom_call.1
= control target key start
LH: loop header
LB: loop body
LE: loop exit
PB: predicated region body
PF: predicated region fallthrough
CT: control target
= control target key end

     0   :  { %10 = vsyncpa [#allocation3], 0  ;;  %s888_s0 = inlined_call_operand.vmem [shape: f32[16,1], index: 0, kind: input, shape index: {}]   ;;  %s889_s1 = inlined_call_operand.vmem [shape: f32[16,1], index: 1, kind: input, shape index: {}]   ;;  %s890_s2 = inlined_call_operand.vmem [shape: f32[1,64], index: 2, kind: input, shape index: {}]   ;;  %s891_s3 = inlined_call_operand.vmem [shape: f32[1,64], index: 3, kind: input, shape index: {}]   ;;  %s892_s4 = inlined_call_operand.hbm [shape: bf16[64,512], index: 4, kind: input, shape index: {}]   ;;  %s893_s5 = inlined_call_operand.hbm [shape: f32[16,64], index: 5, kind: output, shape index: {}]  }
   0x1   :  { %11 = vsyncpa [#allocation4], 0  ;;  %s694_s18 = smov [#allocation2]   ;;  %s646_s22 = scalar_lea.hbm %s892_s4, 2048 }
   0x2   :  { %s25_s19 = sshll.u32 %s694_s18, 4  ;;  %p647_p0 = scmp.ne.s32.totalorder %s892_s4, %s646_s22  ;;  %s26_s19 = int_to_ptr.vmem [resolvable:$true] %s25_s19 }
   0x3   :  { %p650_p1 = scmp.lt.u32.totalorder %s646_s22, %s892_s4 }
   0x5   :  { %p652_p2 = pnand %p650_p1, %p647_p0 }
   0x7   :  { %655 = shalt.err (!%p652_p2)
}
   0x8   :  { %s656_s27 = scalar_lea.vmem %s26_s19, 2048  ;;  %p661_p4 = scmp.lt.s32.totalorder %s26_s19, %s26_s19 }
   0x9   :  { %p657_p3 = scmp.ne.s32.totalorder %s26_s19, %s656_s27  ;;  %p662_p5 = scmp.lt.s32.totalorder %s656_s27, %s656_s27 }
   0xb   :  { %p663_p6 = por %p662_p5, %p661_p4 }
   0xd   :  { %p664_p7 = pnand %p663_p6, %p657_p3 }
   0xf   :  { %667 = shalt.err (!%p664_p7)
}
  0x10   :  { %s695_s28 = smov 256   ;;  %s696_s29 = smov 16  }
  0x11   :  { %31 = dma.hbm_to_vmem [thread:$0]  %s892_s4, 2048, %s26_s19, [#allocation3], %s695_s28, %s695_s28, %s696_s29  }
  0x12   :  { %690 = dma.done.wait [#allocation3], 2048  }
  0x13   :  { %691 = vsyncadd [#allocation3], 4294965248  ;;  %v697_v0 = vmov 0   ;;  %v38_v1 = vld [vmem:[%s889_s1] sm:$0xff]  ;;  %v39_v2 = vld [vmem:[%s889_s1 + $0x8] sm:$0xff]  ;;  %v65_v33 = vlaneseq }
  0x14   :  { %602 = vset.pattern.permute.xlu0 %v697_v0  ;;  %603 = vset.pattern.permute.xlu1 %v697_v0  ;;  %v36_v3 = vld [vmem:[%s888_s0] sm:$0xff]  ;;  %v47_v4 = vmul.f32 0.0003926991, %v38_v1  ;;  %v37_v5 = vld [vmem:[%s888_s0 + $0x8] sm:$0xff]  ;;  %v48_v6 = vmul.f32 0.0003926991, %v39_v2 }
  0x15   :  { %435 = vmatprep.mubr.bf16.mxu0 %v697_v0  ;;  %478 = vmatprep.mubr.bf16.mxu1 %v697_v0  ;;  %628 = vrcp.f32 %v36_v3  ;;  %v604_v17 = vld [vmem:[#allocation2 + $0x4] ss:$16 sps:$4 sm:$0xff]   ;;  %v606_v18 = vld [vmem:[#allocation2 + $0xc] ss:$16 sps:$4 sm:$0xff]   ;;  %v608_v19 = vld [vmem:[#allocation2] ss:$16 sps:$4 sm:$0xff]  }
  0x16   :  { %630 = vrcp.f32 %v37_v5  ;;  %78 = vperm.xlu0 %602, %v47_v4   ;;  %v609_v20 = vld [vmem:[#allocation2 + $0x8] ss:$16 sps:$4 sm:$0xff]   ;;  %v610_v21 = vld [vmem:[#allocation2 + $0x24] ss:$16 sps:$4 sm:$0xff]   ;;  %v612_v22 = vld [vmem:[#allocation2 + $0x2c] ss:$16 sps:$4 sm:$0xff]   ;;  %403 = vmatprep.subr.bf16.mxu0 %v604_v17 }
  0x17   :  { %446 = vmatprep.subr.bf16.mxu1 %v606_v18  ;;  %404 = vmatpush1.bf16.msra.mxu0 %v608_v19  ;;  %v614_v23 = vld [vmem:[#allocation2 + $0x20] ss:$16 sps:$4 sm:$0xff]   ;;  %v615_v24 = vld [vmem:[#allocation2 + $0x28] ss:$16 sps:$4 sm:$0xff]   ;;  %v616_v25 = vld [vmem:[#allocation2 + $0x44] ss:$16 sps:$4 sm:$0xff]  }
  0x18   :  { %447 = vmatpush1.bf16.msra.mxu1 %v609_v20  ;;  %405 = vmatprep.subr.bf16.mxu0 %v610_v21  ;;  %v618_v26 = vld [vmem:[#allocation2 + $0x4c] ss:$16 sps:$4 sm:$0xff]   ;;  %v620_v27 = vld [vmem:[#allocation2 + $0x40] ss:$16 sps:$4 sm:$0xff]   ;;  %v621_v28 = vld [vmem:[#allocation2 + $0x48] ss:$16 sps:$4 sm:$0xff]  }
  0x19   :  { %448 = vmatprep.subr.bf16.mxu1 %v612_v22  ;;  %v622_v29 = vld [vmem:[#allocation2 + $0x64] ss:$16 sps:$4 sm:$0xff]   ;;  %v624_v30 = vld [vmem:[#allocation2 + $0x6c] ss:$16 sps:$4 sm:$0xff]   ;;  %v626_v31 = vld [vmem:[#allocation2 + $0x60] ss:$16 sps:$4 sm:$0xff]  }
  0x1a   :  { %83 = vperm.xlu0 %602, %v48_v6   ;;  %v627_v32 = vld [vmem:[#allocation2 + $0x68] ss:$16 sps:$4 sm:$0xff]   ;;  %v761_v34 = vshrl.u32 %v65_v33, 7  ;;  %v767_v36 = vld [vmem:[%s890_s2] sm:$0x1] }
  0x1b   :  { %406 = vmatpush1.bf16.msra.mxu0 %v614_v23  ;;  %v698_v58 = vmov 683565275   ;;  %v699_v62 = vmov 2475754826   ;;  %v700_v0 = vmov 2131351028  }
  0x1c   :  { %449 = vmatpush1.bf16.msra.mxu1 %v615_v24  ;;  %407 = vmatprep.subr.bf16.mxu0 %v616_v25  ;;  %v67_v35 = vsub.s32 0, %v761_v34  ;;  %v702_v4 = vmov 920167782  }
  0x1d   :  { %450 = vmatprep.subr.bf16.mxu1 %v618_v26 }
  0x1e   :  { %v90_v37 = vrot.slane %v767_v36, %v67_v35 }
  0x1f   :  { %v629_v7 = vpop.eup %628  ;;  %408 = vmatpush1.bf16.msra.mxu0 %v620_v27 }
  0x20   :  { %v631_v8 = vpop.eup %630  ;;  %v42_v9 = vmul.f32 %v629_v7, %v38_v1  ;;  %451 = vmatpush1.bf16.msra.mxu1 %v621_v28  ;;  %409 = vmatprep.subr.bf16.mxu0 %v622_v29 }
  0x21   :  { %v44_v10 = vmul.f32 %v631_v8, %v39_v2  ;;  %452 = vmatprep.subr.bf16.mxu1 %v624_v30  ;;  %v701_v2 = vmov 2102212464  }
  0x22   :  { %v45_v11 = vmul.f32 7.833213e-05, %v42_v9 }
  0x23   :  { %v46_v12 = vmul.f32 7.833213e-05, %v44_v10  ;;  %410 = vmatpush1.bf16.msra.mxu0 %v626_v31 }
  0x24   :  { %v49_v13 = vmul.f32 %v45_v11, %v45_v11  ;;  %453 = vmatpush1.bf16.msra.mxu1 %v627_v32  ;;  %v703_v11 = vmov 1326507024  }
  0x25   :  { %v50_v14 = vmul.f32 %v46_v12, %v46_v12 }
  0x26   :  { %v51_v15 = vsub.f32 0.0, %v49_v13 }
  0x27   :  { %v52_v16 = vsub.f32 0.0, %v50_v14 }
  0x28   :  { %56 = vperm.xlu1 %603, %v51_v15  }
  0x2c   :  { %61 = vperm.xlu1 %603, %v52_v16  }
  0x95   :  { %v79_v38 = vpop.permute.xlu0 %78 }
  0x96   :  { %v772_v39 = vmul.f32 %v90_v37, %v79_v38 }
  0x98   :  { %v94_v40 = vand.u32 2147483647, %v772_v39  ;;  %v97_v41 = vand.u32 2139095040, %v772_v39  ;;  %vm96_vm14 = vcmp.lt.s32.totalorder %v772_v39, 0 }
  0x99   :  { %v84_v42 = vpop.permute.xlu0 %83 }
  0x9a   :  { %v98_v43 = vshrl.u32 %v97_v41, 23  ;;  %v776_v44 = vmul.f32 %v90_v37, %v84_v42  ;;  %v101_v45 = vand.u32 8388607, %v94_v40  ;;  %vm835_vm15 = vcmp.le.f32.partialorder %v94_v40, 0.7853982 }
  0x9c   :  { %v554_v46 = vadd.s32 4294967169, %v98_v43  ;;  %v200_v47 = vand.u32 2139095040, %v776_v44  ;;  %v102_v49 = vor.u32 8388608, %v101_v45  ;;  %v197_v51 = vand.u32 2147483647, %v776_v44 }
  0x9e   :  { %v104_v48 = vadd.s32 1, %v554_v46  ;;  %v201_v50 = vshrl.u32 %v200_v47, 23  ;;  %v782_v56 = vshll.u32 %v102_v49, 8  ;;  %v204_v60 = vand.u32 8388607, %v197_v51 }
  0xa0   :  { %vm105_vm0 = vcmp.gt.s32.totalorder %v104_v48, 0  ;;  %v558_v53 = vadd.s32 4294967169, %v201_v50  ;;  %v205_v26 = vor.u32 8388608, %v204_v60 }
  0xa1   :  { %v106_v52 = vsel %vm105_vm0, %v104_v48, 0  ;;  %vm199_vm0 = vcmp.lt.s32.totalorder %v776_v44, 0 }
  0xa2   :  { %v107_v54 = vshrl.u32 %v106_v52, 5  ;;  %v108_v55 = vand.u32 31, %v106_v52  ;;  %v207_v61 = vadd.s32 1, %v558_v53  ;;  %v245_v45 = vshll.u32 %v205_v26, 8 }
  0xa4   :  { %v109_v57 = vsub.s32 32, %v108_v55  ;;  %v111_v59 = vshll.u32 %v698_v58, %v108_v55  ;;  %v114_v63 = vshll.u32 %v699_v62, %v108_v55  ;;  %v117_v1 = vshll.u32 %v700_v0, %v108_v55 }
  0xa5   :  { %v120_v3 = vshll.u32 %v701_v2, %v108_v55  ;;  %v123_v5 = vshll.u32 %v702_v4, %v108_v55  ;;  %vm126_vm1 = vcmp.lt.s32.totalorder %v107_v54, 1  ;;  %vm128_vm2 = vcmp.lt.s32.totalorder %v107_v54, 3 }
  0xa6   :  { %v112_v6 = vshrl.u32 %v699_v62, %v109_v57  ;;  %v115_v7 = vshrl.u32 %v700_v0, %v109_v57  ;;  %v118_v8 = vshrl.u32 %v701_v2, %v109_v57  ;;  %v110_v9 = vshrl.u32 %v698_v58, %v109_v57 }
  0xa7   :  { %v121_v10 = vshrl.u32 %v702_v4, %v109_v57  ;;  %v124_v12 = vshrl.u32 %v703_v11, %v109_v57  ;;  %vm208_vm3 = vcmp.gt.s32.totalorder %v207_v61, 0  ;;  %vm129_vm4 = vcmp.lt.s32.totalorder %v107_v54, 4 }
  0xa8   :  { %v113_v13 = vor.u32 %v112_v6, %v111_v59  ;;  %v116_v14 = vor.u32 %v115_v7, %v114_v63  ;;  %v119_v15 = vor.u32 %v118_v8, %v117_v1  ;;  %v209_v18 = vsel %vm208_vm3, %v207_v61, 0 }
  0xa9   :  { %v122_v16 = vor.u32 %v121_v10, %v120_v3  ;;  %v125_v17 = vor.u32 %v124_v12, %v123_v5  ;;  %vm127_vm5 = vcmp.lt.s32.totalorder %v107_v54, 2  ;;  %v211_v29 = vand.u32 31, %v209_v18 }
  0xaa   :  { %v130_v19 = vsel %vm126_vm1, %v110_v9, %v113_v13  ;;  %v131_v20 = vsel %vm129_vm4, %v119_v15, 2102212464  ;;  %v134_v21 = vsel %vm126_vm1, %v113_v13, %v116_v14  ;;  %v138_v22 = vsel %vm126_vm1, %v116_v14, %v119_v15 }
  0xab   :  { %v132_v23 = vsel %vm128_vm2, %v116_v14, %v131_v20  ;;  %v135_v24 = vsel %vm129_vm4, %v122_v16, 920167782  ;;  %v139_v25 = vsel %vm129_vm4, %v125_v17, 1326507024  ;;  %v210_v42 = vshrl.u32 %v209_v18, 5 }
  0xac   :  { %v136_v27 = vsel %vm128_vm2, %v119_v15, %v135_v24  ;;  %v140_v28 = vsel %vm128_vm2, %v122_v16, %v139_v25  ;;  %v133_v30 = vsel %vm127_vm5, %v130_v19, %v132_v23  ;;  %v212_v43 = vsub.s32 32, %v211_v29 }
  0xad   :  { %v137_v31 = vsel %vm127_vm5, %v134_v21, %v136_v27  ;;  %v141_v32 = vsel %vm127_vm5, %v138_v22, %v140_v28  ;;  %v149_v46 = vmul.u32 %v782_v56, %v133_v30  ;;  %v214_v47 = vshll.u32 %v698_v58, %v211_v29 }
  0xae   :  { %v795_v33 = vmul.u32.u64.low %v782_v56, %v141_v32  ;;  %v796_v37 = vmul.u32.u64.high %v782_v56, %v141_v32, %v795_v33  ;;  %v799_v38 = vmul.u32.u64.low %v782_v56, %v137_v31  ;;  %v800_v41 = vmul.u32.u64.high %v782_v56, %v137_v31, %v799_v38 }
  0xaf   :  { %v217_v48 = vshll.u32 %v699_v62, %v211_v29  ;;  %v220_v49 = vshll.u32 %v700_v0, %v211_v29  ;;  %v215_v50 = vshrl.u32 %v699_v62, %v212_v43  ;;  %v218_v52 = vshrl.u32 %v700_v0, %v212_v43 }
  0xb0   :  { %v221_v53 = vshrl.u32 %v701_v2, %v212_v43  ;;  %v223_v54 = vshll.u32 %v701_v2, %v211_v29  ;;  %vm151_vm6 = vc.u32 %v796_v37, %v799_v38  ;;  %v152_v55 = vadd.s32 1, %v800_v41 }
  0xb1   :  { %v224_v57 = vshrl.u32 %v702_v4, %v212_v43  ;;  %v226_v59 = vshll.u32 %v702_v4, %v211_v29  ;;  %v216_v60 = vor.u32 %v215_v50, %v214_v47  ;;  %v219_v61 = vor.u32 %v218_v52, %v217_v48 }
  0xb2   :  { %v222_v63 = vor.u32 %v221_v53, %v220_v49  ;;  %v227_v1 = vshrl.u32 %v703_v11, %v212_v43  ;;  %v153_v56 = vsel %vm151_vm6, %v152_v55, %v800_v41  ;;  %vm229_vm7 = vcmp.lt.s32.totalorder %v210_v42, 1 }
  0xb3   :  { %v225_v3 = vor.u32 %v224_v57, %v223_v54  ;;  %vm232_vm8 = vcmp.lt.s32.totalorder %v210_v42, 4  ;;  %v154_v62 = vadd.s32 %v153_v56, %v149_v46  ;;  %vm231_vm9 = vcmp.lt.s32.totalorder %v210_v42, 3 }
  0xb4   :  { %v228_v0 = vor.u32 %v227_v1, %v226_v59  ;;  %v234_v2 = vsel %vm232_vm8, %v222_v63, 2102212464  ;;  %v213_v5 = vshrl.u32 %v698_v58, %v212_v43  ;;  %v237_v6 = vsel %vm229_vm7, %v216_v60, %v219_v61 }
  0xb5   :  { %v238_v7 = vsel %vm232_vm8, %v225_v3, 920167782  ;;  %v241_v8 = vsel %vm229_vm7, %v219_v61, %v222_v63  ;;  %v155_v9 = vadd.s32 536870912, %v154_v62  ;;  %vm230_vm10 = vcmp.lt.s32.totalorder %v210_v42, 2 }
  0xb6   :  { %v239_v4 = vsel %vm231_vm9, %v222_v63, %v238_v7  ;;  %v242_v10 = vsel %vm232_vm8, %v228_v0, 1326507024  ;;  %v233_v12 = vsel %vm229_vm7, %v213_v5, %v216_v60  ;;  %v235_v11 = vsel %vm231_vm9, %v219_v61, %v234_v2  ;;  %v57_v0 = vpop.permute.xlu1 %56 }
  0xb7   :  { %v240_v13 = vsel %vm230_vm10, %v237_v6, %v239_v4  ;;  %v243_v14 = vsel %vm231_vm9, %v225_v3, %v242_v10  ;;  %v810_v15 = vshrl.u32 %v155_v9, 30  ;;  %v236_v21 = vsel %vm230_vm10, %v233_v12, %v235_v11 }
  0xb8   :  { %v244_v16 = vsel %vm230_vm10, %v241_v8, %v243_v14  ;;  %v812_v17 = vmul.u32.u64.low %v245_v45, %v240_v13  ;;  %v813_v18 = vmul.u32.u64.high %v245_v45, %v240_v13, %v812_v17  ;;  %v252_v24 = vmul.u32 %v245_v45, %v236_v21 }
  0xb9   :  { %v815_v19 = vmul.u32.u64.low %v245_v45, %v244_v16  ;;  %v816_v20 = vmul.u32.u64.high %v245_v45, %v244_v16, %v815_v19  ;;  %v157_v58 = vshll.u32 %v810_v15, 30  ;;  %v150_v43 = vadd.s32 %v799_v38, %v796_v37 }
  0xba   :  { %v255_v23 = vadd.s32 1, %v813_v18  ;;  %v53_v55 = vmul.f32 %v767_v36, %v767_v36  ;;  %v180_v8 = vsub.s32 4, %v810_v15  ;;  %vm849_vm1 = vcmp.le.f32.partialorder %v197_v51, 0.7853982 }
  0xbb   :  { %v158_v22 = vsub.s32 %v154_v62, %v157_v58  ;;  %vm254_vm11 = vc.u32 %v816_v20, %v812_v17  ;;  %v253_v56 = vadd.s32 %v812_v17, %v816_v20  ;;  %vm186_vm5 = vweird.f32 %v772_v39 }
  0xbc   :  { %v256_v26 = vsel %vm254_vm11, %v255_v23, %v813_v18  ;;  %v68_v37 = vrot.slane %v53_v55, %v67_v35  ;;  %v181_v13 = vsel %vm96_vm14, %v180_v8, %v810_v15  ;;  %v62_v18 = vpop.permute.xlu1 %61  ;;  %vm399_vm6 = vcmask 523264  }
  0xbd   :  { %v160_v25 = vsub.s32 0, %v158_v22  ;;  %v257_v27 = vadd.s32 %v256_v26, %v252_v24  ;;  %v183_v17 = vsel %vm835_vm15, 0, %v181_v13  ;;  %vm289_vm10 = vweird.f32 %v776_v44 }
  0xbe   :  { %v70_v5 = vmul.f32 %v68_v37, %v57_v0  ;;  %v187_v20 = vand.u32 3, %v183_v17 }
  0xbf   :  { %v555_v28 = vmin.u32 %v160_v25, %v158_v22  ;;  %v258_v29 = vadd.s32 536870912, %v257_v27 }
  0xc0   :  { %v72_v12 = vmul.f32 1.442695, %v70_v5  ;;  %vm192_vm2 = vcmp.eq.s32.totalorder %v187_v20, 2  ;;  %vm189_vm3 = vcmp.eq.s32.totalorder %v187_v20, 0  ;;  %vm188_vm4 = vcmp.lt.s32.totalorder %v187_v20, 2 }
  0xc1   :  { %v162_v30 = vclz %v555_v28  ;;  %v822_v31 = vshrl.u32 %v258_v29, 30 }
  0xc3   :  { %v556_v32 = vadd.s32 4294967294, %v162_v30  ;;  %v260_v33 = vshll.u32 %v822_v31, 30  ;;  %v283_v15 = vsub.s32 4, %v822_v31 }
  0xc5   :  { %vm557_vm12 = vcmp.lt.s32.totalorder %v556_v32, 0  ;;  %v261_v42 = vsub.s32 %v257_v27, %v260_v33  ;;  %v284_v51 = vsel %vm199_vm0, %v283_v15, %v822_v31 }
  0xc6   :  { %v165_v41 = vsel %vm557_vm12, 0, %v556_v32 }
  0xc7   :  { %v166_v45 = vsub.s32 32, %v165_v41  ;;  %v170_v46 = vsub.s32 4294967266, %v165_v41  ;;  %v263_v47 = vsub.s32 0, %v261_v42  ;;  %v167_v48 = vshll.u32 %v158_v22, %v165_v41 }
  0xc8   :  { %v71_v22 = vmul.f32 %v68_v37, %v62_v18  ;;  %v286_v41 = vsel %vm849_vm1, 0, %v284_v51 }
  0xc9   :  { %v168_v49 = vshrl.u32 %v150_v43, %v166_v45  ;;  %v171_v50 = vadd.s32 127, %v170_v46  ;;  %v559_v52 = vmin.u32 %v263_v47, %v261_v42  ;;  %v580_v43 = vld [vmem:[%s891_s3] ss:$0 sm:$0xff]  ;;  %v290_v31 = vand.u32 3, %v286_v41  ;;  %s704_s3 = smov [#allocation5]  }
  0xca   :  { %v74_v28 = vmul.f32 1.442695, %v71_v22  ;;  %s542_s15 = sshll.u32 %s704_s3, 4  ;;  %s543_s15 = int_to_ptr.vmem [resolvable:$true] %s542_s15 }
  0xcb   :  { %v169_v53 = vor.u32 %v168_v49, %v167_v48  ;;  %v172_v54 = vshll.u32 %v171_v50, 23  ;;  %v265_v57 = vclz %v559_v52  ;;  %vm295_vm7 = vcmp.eq.s32.totalorder %v290_v31, 2  ;;  %s668_s16 = scalar_lea.vmem %s543_s15, 256  ;;  %p673_p9 = scmp.lt.s32.totalorder %s543_s15, %s543_s15 }
  0xcc   :  { %vm292_vm8 = vcmp.eq.s32.totalorder %v290_v31, 0  ;;  %vm291_vm9 = vcmp.lt.s32.totalorder %v290_v31, 2  ;;  %p669_p8 = scmp.ne.s32.totalorder %s543_s15, %s668_s16  ;;  %p674_p10 = scmp.lt.s32.totalorder %s668_s16, %s668_s16 }
  0xcd   :  { %v173_v59 = vor.u32 4788187, %v172_v54  ;;  %v560_v60 = vadd.s32 4294967294, %v265_v57  ;;  %v176_v63 = vcvt.s32.f32 %v169_v53 }
  0xce   :  { %p675_p11 = por %p674_p10, %p673_p9 }
  0xcf   :  { %v174_v61 = vand.u32 2147483647, %v173_v59  ;;  %vm561_vm13 = vcmp.lt.s32.totalorder %v560_v60, 0 }
  0xd0   :  { %v268_v1 = vsel %vm561_vm13, 0, %v560_v60  ;;  %p676_p12 = pnand %p675_p11, %p669_p8 }
  0xd1   :  { %v177_v38 = vmul.f32 %v176_v63, %v174_v61  ;;  %v269_v3 = vsub.s32 32, %v268_v1  ;;  %v273_v62 = vsub.s32 4294967266, %v268_v1  ;;  %v270_v36 = vshll.u32 %v261_v42, %v268_v1 }
  0xd3   :  { %v178_v2 = vxor.u32 2147483648, %v177_v38  ;;  %v271_v6 = vshrl.u32 %v253_v56, %v269_v3  ;;  %v274_v7 = vadd.s32 127, %v273_v62 }
  0xd5   :  { %v179_v35 = vsel %vm96_vm14, %v178_v2, %v177_v38  ;;  %v272_v4 = vor.u32 %v271_v6, %v270_v36  ;;  %v275_v10 = vshll.u32 %v274_v7, 23 }
  0xd6   :  { %v182_v9 = vsel %vm835_vm15, %v772_v39, %v179_v35 }
  0xd7   :  { %632 = vcosq.f32 %v182_v9  ;;  %v276_v11 = vor.u32 4788187, %v275_v10  ;;  %v279_v40 = vcvt.s32.f32 %v272_v4 }
  0xd8   :  { %634 = vsinq.f32 %v182_v9 }
  0xd9   :  { %v277_v14 = vand.u32 2147483647, %v276_v11  ;;  %636 = vpow2.f32 %v72_v12 }
  0xdb   :  { %v280_v16 = vmul.f32 %v279_v40, %v277_v14 }
  0xdd   :  { %v281_v19 = vxor.u32 2147483648, %v280_v16 }
  0xdf   :  { %v282_v21 = vsel %vm199_vm0, %v281_v19, %v280_v16 }
  0xe0   :  { %v285_v24 = vsel %vm849_vm1, %v776_v44, %v282_v21 }
  0xe1   :  { %v633_v23 = vpop.eup %632  ;;  %638 = vcosq.f32 %v285_v24 }
  0xe2   :  { %v635_v25 = vpop.eup %634  ;;  %v193_v26 = vxor.u32 2147483648, %v633_v23  ;;  %640 = vsinq.f32 %v285_v24 }
  0xe3   :  { %v190_v27 = vxor.u32 2147483648, %v635_v25  ;;  %v637_v30 = vpop.eup %636  ;;  %642 = vpow2.f32 %v74_v28 }
  0xe4   :  { %v194_v29 = vsel %vm192_vm2, %v193_v26, %v635_v25 }
  0xe5   :  { %v191_v32 = vsel %vm189_vm3, %v633_v23, %v190_v27 }
  0xe6   :  { %v195_v33 = vsel %vm188_vm4, %v191_v32, %v194_v29 }
  0xe7   :  { %v196_v42 = vsel %vm186_vm5, nan, %v195_v33 }
  0xe8   :  { %v864_v45 = vmul.f32 %v637_v30, %v196_v42 }
  0xea   :  { %v508_v46 = vmul.f32 %v580_v43, %v864_v45 }
  0xeb   :  { %v639_v47 = vpop.eup %638 }
  0xec   :  { %v510_v48 = vsel %vm399_vm6, %v508_v46, 0.0  ;;  %v641_v39 = vpop.eup %640  ;;  %v296_v49 = vxor.u32 2147483648, %v639_v47 }
  0xed   :  { %511 = vadd.xlane.f32.xlu0 %v510_v48  ;;  %v293_v50 = vxor.u32 2147483648, %v641_v39  ;;  %v643_v55 = vpop.eup %642 }
  0xee   :  { %v297_v52 = vsel %vm295_vm7, %v296_v49, %v641_v39 }
  0xef   :  { %v294_v53 = vsel %vm292_vm8, %v639_v47, %v293_v50 }
  0xf0   :  { %v298_v54 = vsel %vm291_vm9, %v294_v53, %v297_v52 }
  0xf1   :  { %v299_v57 = vsel %vm289_vm10, nan, %v298_v54 }
  0xf2   :  { %v301_v59 = vmul.f32 %v643_v55, %v299_v57 }
  0xf4   :  { %v302_v60 = vpack.c.bf16 %v301_v59, %v864_v45  ;;  %v509_v61 = vmul.f32 %v580_v43, %v301_v59 }
  0xf6   :  { %578 = vmatmul.mubr.msk.bf16.vlgmr.msra.gmra.mrb[0].mxu0 %vm399_vm6, %v302_v60  ;;  %579 = vmatmul.mubr.msk.bf16.vlgmr.msra.gmra.mrb[0].mxu1 %vm399_vm6, %v302_v60  ;;  %v513_v63 = vsel %vm399_vm6, %v509_v61, 0.0 }
  0xf7   :  { %514 = vadd.xlane.f32.xlu1 %v513_v63 }
 0x17a   :  { %v512_v14 = vpop.xlane.xlu0 %511 }
 0x17b   :  { %v522_v17 = vmul.f32 %v512_v14, %v512_v14 }
 0x184   :  { %v515_v40 = vpop.xlane.xlu1 %514 }
 0x185   :  { %v523_v18 = vmul.f32 %v515_v40, %v515_v40 }
 0x1c9   :  { %v437_v37 = vpop.f32.mrb[0].mxu0  ;;  %v480_v38 = vpop.f32.mrb[0].mxu1 }
 0x1ca   :  { %v489_v1 = vmul.f32 %v437_v37, %v437_v37  ;;  %v493_v56 = vmul.f32 %v480_v38, %v480_v38  ;;  %v439_v3 = vpop.f32.mrb[1].mxu0  ;;  %v482_v44 = vpop.f32.mrb[1].mxu1 }
 0x1cb   :  { %v490_v62 = vmul.f32 %v439_v3, %v439_v3  ;;  %v494_v0 = vmul.f32 %v482_v44, %v482_v44  ;;  %v441_v2 = vpop.f32.mrb[2].mxu0  ;;  %v484_v5 = vpop.f32.mrb[2].mxu1 }
 0x1cc   :  { %v497_v36 = vadd.f32 %v493_v56, %v489_v1  ;;  %v491_v6 = vmul.f32 %v441_v2, %v441_v2  ;;  %v495_v7 = vmul.f32 %v484_v5, %v484_v5  ;;  %v443_v34 = vpop.f32.mrb[3].mxu0  ;;  %v486_v35 = vpop.f32.mrb[3].mxu1 }
 0x1cd   :  { %v498_v8 = vadd.f32 %v494_v0, %v490_v62  ;;  %v492_v9 = vmul.f32 %v443_v34, %v443_v34  ;;  %v496_v4 = vmul.f32 %v486_v35, %v486_v35 }
 0x1ce   :  { %v499_v10 = vadd.f32 %v495_v7, %v491_v6 }
 0x1cf   :  { %v500_v12 = vadd.f32 %v496_v4, %v492_v9  ;;  %v516_v11 = vmax.f32 %v497_v36, %v498_v8 }
 0x1d1   :  { %517 = vmax.xlane.f32.xlu0 %v516_v11  ;;  %v519_v13 = vmax.f32 %v499_v10, %v500_v12 }
 0x1d5   :  { %520 = vmax.xlane.f32.xlu0 %v519_v13 }
 0x25e   :  { %v518_v16 = vpop.xlane.xlu0 %517 }
 0x25f   :  { %v524_v20 = vmax.f32 %v518_v16, %v522_v17 }
 0x262   :  { %v521_v19 = vpop.xlane.xlu0 %520 }
 0x263   :  { %v525_v58 = vmax.f32 %v521_v19, %v523_v18 }
 0x265   :  { %v526_v21 = vmax.f32 %v524_v20, %v525_v58 }
 0x267   :  { %644 = vrsqrt.f32 %v526_v21 }
 0x271   :  { %v645_v15 = vpop.eup %644 }
 0x272   :  { %530 = vperm.xlu1 %603, %v645_v15  }
 0x2f1   :  { %v531_v22 = vpop.permute.xlu1 %530 }
 0x2f2   :  { %v533_v23 = vmul.f32 %v531_v22, %v864_v45  ;;  %v534_v24 = vmul.f32 %v531_v22, %v301_v59 }
 0x2f4   :  { %535 = vst.msk [vmem:[#allocation5] sm:$0xff] %vm399_vm6, %v533_v23  ;;  %536 = vst.msk [vmem:[#allocation5 + $0x8] sm:$0xff] %vm399_vm6, %v534_v24 }
 0x2f5   :  { %679 = shalt.err (!%p676_p12)
}
 0x2f6   :  { %s680_s19 = scalar_lea.hbm %s893_s5, 256 }
 0x2f7   :  { %p681_p13 = scmp.ne.s32.totalorder %s893_s5, %s680_s19  ;;  %p684_p0 = scmp.lt.u32.totalorder %s680_s19, %s893_s5 }
 0x2f9   :  { %p686_p1 = pnand %p684_p0, %p681_p13 }
 0x2fb   :  { %689 = shalt.err (!%p686_p1)
}
 0x2fc   :  { %s705_s24 = smov 128   ;;  %s706_s25 = smov 8  }
 0x2fd   :  { %548 = dma.vmem_to_hbm [thread:$0]  %s543_s15, 256, %s893_s5, [#allocation4], %s705_s24, %s705_s24, %s706_s25  }
 0x2fe   :  { %692 = dma.done.wait [#allocation4], 256  }
 0x2ff   :  { %693 = vsyncadd [#allocation4], 4294967040 }
 0x300   :  { %552 = vsyncpa [#allocation3], 1 }
 0x301   :  { %553 = vsyncpa [#allocation4], 1 }

</bundles_post_ra>
